<compile_context>
chip_gen: v7x
topology: tpu7x:2x2x1
jax: 0.10.0
libtpu: 0.0.40
codegen_flags: <defaults>
</compile_context>

<pallas_src>
import functools

import jax
import jax.numpy as jnp
import numpy as np
from jax.experimental import pallas as pl
from jax.experimental.pallas import tpu as pltpu


def _round_up(n, m):
    return ((n + m - 1) // m) * m


def _rnn_kernel(x_ref,        # ((T+1)*Bp, E)  time-padded, batch-padded, flattened input
                packA_ref,    # (rowsA, 2H)    [W_wide ; b_wide ; W_blk] (8-row aligned sections)
                packB_ref,    # (rowsB, 128)   [W_head ; b_head]
                out_ref,      # (Bp, 128)      lane-dense output
                add_ref,      # scratch ((T+1)*Bp, 2H)  per-step additive slab
                *, T, Bp, E, H):
    H2 = 2 * H
    off_bw = _round_up(E, 8)          # bias row offset in packA
    off_blk = off_bw + 8              # block-recurrent-weight offset in packA
    off_bh = _round_up(H2, 8)         # head-bias row offset in packB

    w_wide = packA_ref[0:E, :]                    # (E, 2H)  = [W_ih0^T | 0]
    b_wide = packA_ref[off_bw:off_bw + 1, :]      # (1, 2H)  = [b_ih0+b_hh0 | b_ih1+b_hh1]
    w_blk = packA_ref[off_blk:off_blk + H2, :]    # (2H, 2H) = [[W_hh0^T, W_ih1^T], [0, W_hh1^T]]
    w_head = packB_ref[0:H2, :]                   # (2H, 128) rows [0:H)=0, [H:2H)=W1^T@W2^T
    b_head = packB_ref[off_bh:off_bh + 1, :]      # (1, 128)

    # Hoisted non-recurrent projection for all T+1 time slots in ONE matmul:
    #   d[t*Bp + b] = [x_t[b] @ W_ih0^T + b0 | b1]
    d = jnp.dot(x_ref[...], w_wide, preferred_element_type=jnp.float32) + b_wide
    add_ref[...] = d

    # Initial skewed carry c = [h0_0 | h1_{-1}] = [relu(x_0 @ W_ih0^T + b0) | 0].
    lane = jax.lax.broadcasted_iota(jnp.int32, (Bp, H2), 1)
    c0 = jnp.where(lane < H, jnp.maximum(d[0:Bp, :], 0.0), 0.0)

    # Skewed recurrence: one MXU push + one vreg add + relu per step.
    #   [h0_t | h1_{t-1}] @ W_blk + [xproj[t+1]+b0 | b1]  --relu-->  [h0_{t+1} | h1_t]
    def step(s, c):
        row = pl.multiple_of(s * Bp, Bp)
        pre = jnp.dot(c, w_blk, preferred_element_type=jnp.float32) \
            + add_ref[pl.ds(row, Bp), :]
        return jnp.maximum(pre, 0.0)

    c = jax.lax.fori_loop(1, T + 1, step, c0, unroll=min(T, 8))

    # c = [h0_T (don't-care) | h1_{T-1}]; head's top H rows are zero, so only the
    # h1 half contributes.  Lane-dense (Bp, 128) store.
    out_ref[...] = jnp.dot(c, w_head, preferred_element_type=jnp.float32) + b_head


def prepare_params(params):
    """One-time fold of PyTorch-convention weights into two packed kernel operands."""
    f32 = jnp.float32
    H = params["W_hh0"].shape[0]
    E = params["W_ih0"].shape[1]
    H2 = 2 * H

    b0 = (params["b_ih0"] + params["b_hh0"]).astype(f32)
    b1 = (params["b_ih1"] + params["b_hh1"]).astype(f32)

    w_wide = jnp.concatenate([params["W_ih0"].T.astype(f32),
                              jnp.zeros((E, H), f32)], axis=1)               # (E, 2H)
    b_wide = jnp.concatenate([b0, b1]).reshape(1, H2)                        # (1, 2H)
    w_blk = jnp.concatenate([
        jnp.concatenate([params["W_hh0"].T, params["W_ih1"].T], axis=1),
        jnp.concatenate([jnp.zeros((H, H), f32), params["W_hh1"].T], axis=1),
    ], axis=0).astype(f32)                                                   # (2H, 2H)

    # Folded output head (no nonlinearity between linear1 and linear2).
    wf = (params["W1"].T @ params["W2"].T).astype(f32)                       # (H, 2)
    bf = (params["b1"] @ params["W2"].T + params["b2"]).astype(f32)          # (2,)
    n_out = wf.shape[1]
    OUTP = 128                                                               # lane-dense width

    off_bw = _round_up(E, 8)
    off_blk = off_bw + 8
    rows_a = _round_up(off_blk + H2, 8)
    packA = jnp.zeros((rows_a, H2), f32)
    packA = packA.at[0:E, :].set(w_wide)
    packA = packA.at[off_bw:off_bw + 1, :].set(b_wide)
    packA = packA.at[off_blk:off_blk + H2, :].set(w_blk)

    off_bh = _round_up(H2, 8)
    rows_b = off_bh + 8
    packB = jnp.zeros((rows_b, OUTP), f32)
    packB = packB.at[H:H2, 0:n_out].set(wf)        # top H rows stay zero on purpose
    packB = packB.at[off_bh, 0:n_out].set(bf)

    return {"packA": packA, "packB": packB, "n_out": n_out}


@functools.partial(jax.jit, static_argnames=("n_out",))
def rnn_forward(x, packA, packB, n_out=2):
    """x: (T, B, E) float32; packA/packB from prepare_params."""
    T, B, E = x.shape
    H2 = packA.shape[1]
    H = H2 // 2
    OUTP = packB.shape[1]

    # Pad batch (sublane / matmul-M dim) to a multiple of 8, add one zero timestep
    # for the layer-skew, flatten to 2D in the wrapper (free layout metadata).
    Bp = _round_up(B, 8)
    x_p = jnp.pad(x.astype(jnp.float32), ((0, 1), (0, Bp - B), (0, 0)))
    x2d = x_p.reshape((T + 1) * Bp, E)

    kernel = functools.partial(_rnn_kernel, T=T, Bp=Bp, E=E, H=H)
    vmem = pl.BlockSpec(memory_space=pltpu.MemorySpace.VMEM)
    out = pl.pallas_call(
        kernel,
        out_shape=jax.ShapeDtypeStruct((Bp, OUTP), jnp.float32),
        in_specs=[vmem, vmem, vmem],
        out_specs=vmem,
        scratch_shapes=[pltpu.VMEM(((T + 1) * Bp, H2), jnp.float32)],
    )(x2d, packA, packB)
    return out[:B, :n_out]


def rnn_forward_reference(x, p):
    """Pure-JAX reference (PyTorch nn.RNN eval-mode semantics)."""
    T, B, E = x.shape
    H = p["W_hh0"].shape[0]
    h0 = jnp.zeros((B, H), jnp.float32)
    h1 = jnp.zeros((B, H), jnp.float32)
    for t in range(T):
        h0 = jax.nn.relu(x[t] @ p["W_ih0"].T + p["b_ih0"] + h0 @ p["W_hh0"].T + p["b_hh0"])
        h1 = jax.nn.relu(h0 @ p["W_ih1"].T + p["b_ih1"] + h1 @ p["W_hh1"].T + p["b_hh1"])
    y = h1 @ p["W1"].T + p["b1"]
    return y @ p["W2"].T + p["b2"]


def init_params(key, embedding_len, hidden_size):
    ks = jax.random.split(key, 12)

    def uni(k, shape, bound):
        return jax.random.uniform(k, shape, jnp.float32, -bound, bound)

    bh = 1.0 / np.sqrt(hidden_size)
    return {
        # RNN layer 0
        "W_ih0": uni(ks[0], (hidden_size, embedding_len), bh),
        "W_hh0": uni(ks[1], (hidden_size, hidden_size), bh),
        "b_ih0": uni(ks[2], (hidden_size,), bh),
        "b_hh0": uni(ks[3], (hidden_size,), bh),
        # RNN layer 1
        "W_ih1": uni(ks[4], (hidden_size, hidden_size), bh),
        "W_hh1": uni(ks[5], (hidden_size, hidden_size), bh),
        "b_ih1": uni(ks[6], (hidden_size,), bh),
        "b_hh1": uni(ks[7], (hidden_size,), bh),
        # Linear1: 6 -> 200
        "W1": uni(ks[8], (200, hidden_size), 1.0 / np.sqrt(hidden_size)),
        "b1": uni(ks[9], (200,), 1.0 / np.sqrt(hidden_size)),
        # Linear2: 200 -> 2
        "W2": uni(ks[10], (2, 200), 1.0 / np.sqrt(200)),
        "b2": uni(ks[11], (2,), 1.0 / np.sqrt(200)),
    }


if __name__ == "__main__":
    seq_len, batch, embedding_len, hidden_size = 8, 4, 16, 6

    key = jax.random.PRNGKey(0)
    k_x, k_p = jax.random.split(key)
    x = jax.random.normal(k_x, (seq_len, batch, embedding_len), jnp.float32)
    params = init_params(k_p, embedding_len, hidden_size)

    prepped = prepare_params(params)  # one-time weight folding, off the per-call path
    out = jax.block_until_ready(
        rnn_forward(x, prepped["packA"], prepped["packB"], n_out=prepped["n_out"]))
    ref = jax.block_until_ready(rnn_forward_reference(x, params))

    assert out.shape == (batch, 2), out.shape
    np.testing.assert_allclose(np.asarray(out), np.asarray(ref), rtol=1e-3, atol=1e-3)
    print("KERNEL_OK")
</pallas_src>

<mosaic_0001>
module attributes {stable_mosaic.version = 11 : i64} {
  func.func @_rnn_kernel(%arg0: memref<72x16xf32, #tpu.memory_space<vmem>>, %arg1: memref<40x12xf32, #tpu.memory_space<vmem>>, %arg2: memref<24x128xf32, #tpu.memory_space<vmem>>, %arg3: memref<8x128xf32, #tpu.memory_space<vmem>>, %arg4: memref<72x12xf32, #tpu.memory_space<vmem>>) attributes {dimension_semantics = [], scalar_prefetch = 0 : i64, scratch_operands = 1 : i64, tpu.core_type = #tpu.core_type<tc>} {
    %c0 = arith.constant 0 : index
    %c0_0 = arith.constant 0 : index
    %0 = vector.load %arg1[%c0, %c0_0] : memref<40x12xf32, #tpu.memory_space<vmem>>, vector<16x12xf32>
    %c16 = arith.constant 16 : index
    %c0_1 = arith.constant 0 : index
    %1 = vector.load %arg1[%c16, %c0_1] : memref<40x12xf32, #tpu.memory_space<vmem>>, vector<1x12xf32>
    %c24 = arith.constant 24 : index
    %c0_2 = arith.constant 0 : index
    %2 = vector.load %arg1[%c24, %c0_2] : memref<40x12xf32, #tpu.memory_space<vmem>>, vector<12x12xf32>
    %c0_3 = arith.constant 0 : index
    %c0_4 = arith.constant 0 : index
    %3 = vector.load %arg2[%c0_3, %c0_4] : memref<24x128xf32, #tpu.memory_space<vmem>>, vector<12x128xf32>
    %c16_5 = arith.constant 16 : index
    %c0_6 = arith.constant 0 : index
    %4 = vector.load %arg2[%c16_5, %c0_6] : memref<24x128xf32, #tpu.memory_space<vmem>>, vector<1x128xf32>
    %c0_7 = arith.constant 0 : index
    %c0_8 = arith.constant 0 : index
    %5 = vector.load %arg0[%c0_7, %c0_8] : memref<72x16xf32, #tpu.memory_space<vmem>>, vector<72x16xf32>
    %cst = arith.constant dense<0.000000e+00> : vector<72x12xf32>
    %6 = tpu.matmul %5, %0, %cst {dimension_numbers = #tpu.dot_dimension_numbers<[1], [0], [0], [1], [0, 0, 1, 1], [], []>} : vector<72x16xf32>, vector<16x12xf32>, vector<72x12xf32> -> vector<72x12xf32>
    %7 = vector.broadcast %1 : vector<1x12xf32> to vector<72x12xf32>
    %8 = arith.addf %6, %7 : vector<72x12xf32>
    %c0_9 = arith.constant 0 : index
    %c0_10 = arith.constant 0 : index
    %9 = vector.load %arg4[%c0_9, %c0_10] : memref<72x12xf32, #tpu.memory_space<vmem>>, vector<72x12xf32>
    tpu.vector_store %arg4[%c0_9, %c0_10], %8 {strides = array<i32>} : memref<72x12xf32, #tpu.memory_space<vmem>>, vector<72x12xf32>,
    %10 = tpu.iota {dimensions = array<i32: 1>} : vector<8x12xi32>
    %c6_i32 = arith.constant 6 : i32
    %11 = vector.broadcast %c6_i32 : i32 to vector<8x12xi32>
    %12 = arith.cmpi slt, %10, %11 : vector<8x12xi32>
    %13 = vector.extract_strided_slice %8 {offsets = [0, 0], sizes = [8, 12], strides = [1, 1]} : vector<72x12xf32> to vector<8x12xf32>
    %cst_11 = arith.constant 0.000000e+00 : f32
    %14 = vector.broadcast %cst_11 : f32 to vector<8x12xf32>
    %15 = arith.maximumf %13, %14 : vector<8x12xf32>
    %cst_12 = arith.constant 0.000000e+00 : f32
    %16 = vector.broadcast %cst_12 : f32 to vector<8x12xf32>
    %17 = arith.select %12, %15, %16 : vector<8x12xi1>, vector<8x12xf32>
    %c1_i32 = arith.constant 1 : i32
    %c8_i32 = arith.constant 8 : i32
    %18 = arith.muli %c1_i32, %c8_i32 : i32
    %19 = tpu.assume_multiple %18, 8 : i32
    %cst_13 = arith.constant dense<0.000000e+00> : vector<8x12xf32>
    %20 = tpu.matmul %17, %2, %cst_13 {dimension_numbers = #tpu.dot_dimension_numbers<[1], [0], [0], [1], [0, 0, 1, 1], [], []>} : vector<8x12xf32>, vector<12x12xf32>, vector<8x12xf32> -> vector<8x12xf32>
    %21 = arith.index_cast %19 : i32 to index
    %c0_14 = arith.constant 0 : index
    %22 = vector.load %arg4[%21, %c0_14] : memref<72x12xf32, #tpu.memory_space<vmem>>, vector<8x12xf32>
    %23 = arith.addf %20, %22 : vector<8x12xf32>
    %cst_15 = arith.constant 0.000000e+00 : f32
    %24 = vector.broadcast %cst_15 : f32 to vector<8x12xf32>
    %25 = arith.maximumf %23, %24 : vector<8x12xf32>
    %c2_i32 = arith.constant 2 : i32
    %c8_i32_16 = arith.constant 8 : i32
    %26 = arith.muli %c2_i32, %c8_i32_16 : i32
    %27 = tpu.assume_multiple %26, 8 : i32
    %cst_17 = arith.constant dense<0.000000e+00> : vector<8x12xf32>
    %28 = tpu.matmul %25, %2, %cst_17 {dimension_numbers = #tpu.dot_dimension_numbers<[1], [0], [0], [1], [0, 0, 1, 1], [], []>} : vector<8x12xf32>, vector<12x12xf32>, vector<8x12xf32> -> vector<8x12xf32>
    %29 = arith.index_cast %27 : i32 to index
    %c0_18 = arith.constant 0 : index
    %30 = vector.load %arg4[%29, %c0_18] : memref<72x12xf32, #tpu.memory_space<vmem>>, vector<8x12xf32>
    %31 = arith.addf %28, %30 : vector<8x12xf32>
    %cst_19 = arith.constant 0.000000e+00 : f32
    %32 = vector.broadcast %cst_19 : f32 to vector<8x12xf32>
    %33 = arith.maximumf %31, %32 : vector<8x12xf32>
    %c3_i32 = arith.constant 3 : i32
    %c8_i32_20 = arith.constant 8 : i32
    %34 = arith.muli %c3_i32, %c8_i32_20 : i32
    %35 = tpu.assume_multiple %34, 8 : i32
    %cst_21 = arith.constant dense<0.000000e+00> : vector<8x12xf32>
    %36 = tpu.matmul %33, %2, %cst_21 {dimension_numbers = #tpu.dot_dimension_numbers<[1], [0], [0], [1], [0, 0, 1, 1], [], []>} : vector<8x12xf32>, vector<12x12xf32>, vector<8x12xf32> -> vector<8x12xf32>
    %37 = arith.index_cast %35 : i32 to index
    %c0_22 = arith.constant 0 : index
    %38 = vector.load %arg4[%37, %c0_22] : memref<72x12xf32, #tpu.memory_space<vmem>>, vector<8x12xf32>
    %39 = arith.addf %36, %38 : vector<8x12xf32>
    %cst_23 = arith.constant 0.000000e+00 : f32
    %40 = vector.broadcast %cst_23 : f32 to vector<8x12xf32>
    %41 = arith.maximumf %39, %40 : vector<8x12xf32>
    %c4_i32 = arith.constant 4 : i32
    %c8_i32_24 = arith.constant 8 : i32
    %42 = arith.muli %c4_i32, %c8_i32_24 : i32
    %43 = tpu.assume_multiple %42, 8 : i32
    %cst_25 = arith.constant dense<0.000000e+00> : vector<8x12xf32>
    %44 = tpu.matmul %41, %2, %cst_25 {dimension_numbers = #tpu.dot_dimension_numbers<[1], [0], [0], [1], [0, 0, 1, 1], [], []>} : vector<8x12xf32>, vector<12x12xf32>, vector<8x12xf32> -> vector<8x12xf32>
    %45 = arith.index_cast %43 : i32 to index
    %c0_26 = arith.constant 0 : index
    %46 = vector.load %arg4[%45, %c0_26] : memref<72x12xf32, #tpu.memory_space<vmem>>, vector<8x12xf32>
    %47 = arith.addf %44, %46 : vector<8x12xf32>
    %cst_27 = arith.constant 0.000000e+00 : f32
    %48 = vector.broadcast %cst_27 : f32 to vector<8x12xf32>
    %49 = arith.maximumf %47, %48 : vector<8x12xf32>
    %c5_i32 = arith.constant 5 : i32
    %c8_i32_28 = arith.constant 8 : i32
    %50 = arith.muli %c5_i32, %c8_i32_28 : i32
    %51 = tpu.assume_multiple %50, 8 : i32
    %cst_29 = arith.constant dense<0.000000e+00> : vector<8x12xf32>
    %52 = tpu.matmul %49, %2, %cst_29 {dimension_numbers = #tpu.dot_dimension_numbers<[1], [0], [0], [1], [0, 0, 1, 1], [], []>} : vector<8x12xf32>, vector<12x12xf32>, vector<8x12xf32> -> vector<8x12xf32>
    %53 = arith.index_cast %51 : i32 to index
    %c0_30 = arith.constant 0 : index
    %54 = vector.load %arg4[%53, %c0_30] : memref<72x12xf32, #tpu.memory_space<vmem>>, vector<8x12xf32>
    %55 = arith.addf %52, %54 : vector<8x12xf32>
    %cst_31 = arith.constant 0.000000e+00 : f32
    %56 = vector.broadcast %cst_31 : f32 to vector<8x12xf32>
    %57 = arith.maximumf %55, %56 : vector<8x12xf32>
    %c6_i32_32 = arith.constant 6 : i32
    %c8_i32_33 = arith.constant 8 : i32
    %58 = arith.muli %c6_i32_32, %c8_i32_33 : i32
    %59 = tpu.assume_multiple %58, 8 : i32
    %cst_34 = arith.constant dense<0.000000e+00> : vector<8x12xf32>
    %60 = tpu.matmul %57, %2, %cst_34 {dimension_numbers = #tpu.dot_dimension_numbers<[1], [0], [0], [1], [0, 0, 1, 1], [], []>} : vector<8x12xf32>, vector<12x12xf32>, vector<8x12xf32> -> vector<8x12xf32>
    %61 = arith.index_cast %59 : i32 to index
    %c0_35 = arith.constant 0 : index
    %62 = vector.load %arg4[%61, %c0_35] : memref<72x12xf32, #tpu.memory_space<vmem>>, vector<8x12xf32>
    %63 = arith.addf %60, %62 : vector<8x12xf32>
    %cst_36 = arith.constant 0.000000e+00 : f32
    %64 = vector.broadcast %cst_36 : f32 to vector<8x12xf32>
    %65 = arith.maximumf %63, %64 : vector<8x12xf32>
    %c7_i32 = arith.constant 7 : i32
    %c8_i32_37 = arith.constant 8 : i32
    %66 = arith.muli %c7_i32, %c8_i32_37 : i32
    %67 = tpu.assume_multiple %66, 8 : i32
    %cst_38 = arith.constant dense<0.000000e+00> : vector<8x12xf32>
    %68 = tpu.matmul %65, %2, %cst_38 {dimension_numbers = #tpu.dot_dimension_numbers<[1], [0], [0], [1], [0, 0, 1, 1], [], []>} : vector<8x12xf32>, vector<12x12xf32>, vector<8x12xf32> -> vector<8x12xf32>
    %69 = arith.index_cast %67 : i32 to index
    %c0_39 = arith.constant 0 : index
    %70 = vector.load %arg4[%69, %c0_39] : memref<72x12xf32, #tpu.memory_space<vmem>>, vector<8x12xf32>
    %71 = arith.addf %68, %70 : vector<8x12xf32>
    %cst_40 = arith.constant 0.000000e+00 : f32
    %72 = vector.broadcast %cst_40 : f32 to vector<8x12xf32>
    %73 = arith.maximumf %71, %72 : vector<8x12xf32>
    %c8_i32_41 = arith.constant 8 : i32
    %c8_i32_42 = arith.constant 8 : i32
    %74 = arith.muli %c8_i32_41, %c8_i32_42 : i32
    %75 = tpu.assume_multiple %74, 8 : i32
    %cst_43 = arith.constant dense<0.000000e+00> : vector<8x12xf32>
    %76 = tpu.matmul %73, %2, %cst_43 {dimension_numbers = #tpu.dot_dimension_numbers<[1], [0], [0], [1], [0, 0, 1, 1], [], []>} : vector<8x12xf32>, vector<12x12xf32>, vector<8x12xf32> -> vector<8x12xf32>
    %77 = arith.index_cast %75 : i32 to index
    %c0_44 = arith.constant 0 : index
    %78 = vector.load %arg4[%77, %c0_44] : memref<72x12xf32, #tpu.memory_space<vmem>>, vector<8x12xf32>
    %79 = arith.addf %76, %78 : vector<8x12xf32>
    %cst_45 = arith.constant 0.000000e+00 : f32
    %80 = vector.broadcast %cst_45 : f32 to vector<8x12xf32>
    %81 = arith.maximumf %79, %80 : vector<8x12xf32>
    %c8_i32_46 = arith.constant 8 : i32
    %cst_47 = arith.constant dense<0.000000e+00> : vector<8x128xf32>
    %82 = tpu.matmul %81, %3, %cst_47 {dimension_numbers = #tpu.dot_dimension_numbers<[1], [0], [0], [1], [0, 0, 1, 1], [], []>} : vector<8x12xf32>, vector<12x128xf32>, vector<8x128xf32> -> vector<8x128xf32>
    %83 = vector.broadcast %4 : vector<1x128xf32> to vector<8x128xf32>
    %84 = arith.addf %82, %83 : vector<8x128xf32>
    %c0_48 = arith.constant 0 : index
    %c0_49 = arith.constant 0 : index
    %85 = vector.load %arg3[%c0_48, %c0_49] : memref<8x128xf32, #tpu.memory_space<vmem>>, vector<8x128xf32>
    tpu.vector_store %arg3[%c0_48, %c0_49], %84 {strides = array<i32>} : memref<8x128xf32, #tpu.memory_space<vmem>>, vector<8x128xf32>,
    return
  }
}

</mosaic_0001>

<bundles_post_ra>
// kernel: rnn_forward.1
= control target key start
LH: loop header
LB: loop body
LE: loop exit
PB: predicated region body
PF: predicated region fallthrough
CT: control target
= control target key end

     0   :  { %v1089_v0 = vmov 0.0|0.0   ;;  %vm1090_vm0 = vmmov 0   ;;  %v1091_v3 = vmov 0.0   ;;  %vm35_vm1 = vcmask 130048   ;;  %s1282_s1 = inlined_call_operand.vmem [shape: f32[40,12], index: 1, kind: input, shape index: {}]   ;;  %s1283_s0 = inlined_call_operand.vmem [shape: f32[72,16], index: 0, kind: input, shape index: {}]   ;;  %s1284_s2 = inlined_call_operand.vmem [shape: f32[24,128], index: 2, kind: input, shape index: {}]   ;;  %s1285_s3 = inlined_call_operand.vmem [shape: f32[8,128], index: 3, kind: output, shape index: {}]  }
   0x1   :  { %1046 = vmatprep.subr.bf16.mxu0 %v1089_v0  ;;  %v14_v1 = vld [vmem:[%s1282_s1] sm:$0xff]  ;;  %v15_v2 = vld [vmem:[%s1282_s1 + $0x8] sm:$0xff]  ;;  %956 = vmatprep.mubr.msk.f32.mxu0 %vm1090_vm0, %v1091_v3  ;;  %v17_v7 = vld [vmem:[%s1282_s1 + $0x18] sm:$0xff]  ;;  %vm193_vm2 = vcmask 1043456   ;;  %vm1092_vm3 = vmmov 1   ;;  %v183_v12 = vlaneseq  ;;  %vm173_vm5 = vcmask 97280  }
   0x2   :  { %v1047_v4 = vpack.c.bf16 %v15_v2, %v14_v1  ;;  %1049 = vmatprep.subr.bf16.mxu1 %v1089_v0  ;;  %987 = vmatprep.mubr.msk.f32.mxu1 %vm1090_vm0, %v1091_v3  ;;  %v22_v5 = vld [vmem:[%s1283_s0] sm:$0xff]  ;;  %v23_v6 = vld [vmem:[%s1283_s0 + $0x8] sm:$0xff]  ;;  %vm1145_vm4 = vmpackc.low %vm193_vm2, %vm1092_vm3 }
   0x3   :  { %v18_v8 = vld [vmem:[%s1282_s1 + $0x20] sm:$0xf]  ;;  %v24_v11 = vld [vmem:[%s1283_s0 + $0x10] sm:$0xff]  ;;  %v184_v14 = vand.u32 127, %v183_v12  ;;  %v25_v24 = vld [vmem:[%s1283_s0 + $0x18] sm:$0xff] }
   0x4   :  { %1048 = vmatpush3.bf16.msra.mxu0 %v1047_v4  ;;  %v1143_v9 = vpack.c.bf16 %v18_v8, %v17_v7  ;;  %v1162_v13 = vld [vmem:[%s1282_s1 + $0x10] ss:$0 sm:$0xff]  ;;  %v26_v33 = vld [vmem:[%s1283_s0 + $0x20] sm:$0xff]  ;;  %v27_v42 = vld [vmem:[%s1283_s0 + $0x28] sm:$0xff] }
   0x5   :  { %vm185_vm6 = vcmp.lt.s32.totalorder %v184_v14, 6  ;;  %v28_v51 = vld [vmem:[%s1283_s0 + $0x30] sm:$0xff]  ;;  %v29_v60 = vld [vmem:[%s1283_s0 + $0x38] sm:$0xff]  ;;  %v30_v7 = vld [vmem:[%s1283_s0 + $0x40] sm:$0xff] }
   0x6   :  { %1052 = vmatpush3.bf16.msk.msra.mxu1 %vm1145_vm4, %v1143_v9 }
   0x7   :  { %957 = vmatmul.mubr.msk.f32.vlgmr.msra.gmra.mrb[0].mxu0 %vm35_vm1, %v22_v5  ;;  %1053 = vmatprep.subr.bf16.mxu1 %v1089_v0 }
   0x8   :  { %959 = vmatprep.mubr.msk.f32.mxu0 %vm1090_vm0, %v1091_v3 }
   0xb   :  { %960 = vmatmul.mubr.msk.f32.gmra.mrb[2].mxu0 %vm35_vm1, %v23_v6 }
   0xc   :  { %962 = vmatprep.mubr.msk.f32.mxu0 %vm1090_vm0, %v1091_v3 }
   0xf   :  { %963 = vmatmul.mubr.msk.f32.gmra.mrb[4].mxu0 %vm35_vm1, %v24_v11 }
  0x10   :  { %965 = vmatprep.mubr.msk.f32.mxu0 %vm1090_vm0, %v1091_v3 }
  0x13   :  { %966 = vmatmul.mubr.msk.f32.gmra.mrb[6].mxu0 %vm35_vm1, %v25_v24 }
  0x14   :  { %968 = vmatprep.mubr.msk.f32.mxu0 %vm1090_vm0, %v1091_v3 }
  0x17   :  { %969 = vmatmul.mubr.msk.f32.gmra.mrb[8].mxu0 %vm35_vm1, %v26_v33 }
  0x18   :  { %971 = vmatprep.mubr.msk.f32.mxu0 %vm1090_vm0, %v1091_v3 }
  0x1b   :  { %972 = vmatmul.mubr.msk.f32.gmra.mrb[10].mxu0 %vm35_vm1, %v27_v42 }
  0x1c   :  { %974 = vmatprep.mubr.msk.f32.mxu0 %vm1090_vm0, %v1091_v3 }
  0x1f   :  { %975 = vmatmul.mubr.msk.f32.gmra.mrb[12].mxu0 %vm35_vm1, %v28_v51 }
  0x20   :  { %977 = vmatprep.mubr.msk.f32.mxu0 %vm1090_vm0, %v1091_v3 }
  0x23   :  { %978 = vmatmul.mubr.msk.f32.gmra.mrb[14].mxu0 %vm35_vm1, %v29_v60 }
  0x24   :  { %980 = vmatprep.mubr.msk.f32.mxu0 %vm1090_vm0, %v1091_v3 }
  0x27   :  { %981 = vmatmul.mubr.msk.f32.gmra.mrb[16].mxu0 %vm35_vm1, %v30_v7 }
  0xda   :  { %v129_v15 = vpop.f32.mrb[0].mxu0 }
  0xdb   :  { %v130_v16 = vadd.f32 %v1162_v13, %v129_v15  ;;  %v958_v17 = vpop.f32.mrb[1].mxu0 }
  0xdd   :  { %v186_v18 = vmax.f32 %v130_v16, 0.0 }
  0xde   :  { %v134_v19 = vpop.f32.mrb[2].mxu0 }
  0xdf   :  { %v187_v20 = vsel %vm185_vm6, %v186_v18, 0.0  ;;  %v135_v21 = vadd.f32 %v1162_v13, %v134_v19  ;;  %v961_v22 = vpop.f32.mrb[3].mxu0 }
  0xe0   :  { %988 = vmatmul.mubr.msk.f32.vlgmr.msra.gmra.mrb[0].mxu1 %vm173_vm5, %v187_v20 }
  0xe1   :  { %175 = vst.msk [vmem:[#allocation2 + $0x8] sm:$0xff] %vm173_vm5, %v135_v21  ;;  %1056 = vmatpush3.bf16.msk.msra.mxu1 %vm1145_vm4, %v1143_v9  ;;  %994 = vmatprep.mubr.msk.f32.mxu1 %vm1090_vm0, %v1091_v3 }
  0xe2   :  { %1057 = vmatprep.subr.bf16.mxu1 %v1089_v0  ;;  %v139_v23 = vpop.f32.mrb[4].mxu0 }
  0xe3   :  { %v140_v25 = vadd.f32 %v1162_v13, %v139_v23  ;;  %v964_v26 = vpop.f32.mrb[5].mxu0 }
  0xe5   :  { %176 = vst.msk [vmem:[#allocation2 + $0x10] sm:$0xff] %vm173_vm5, %v140_v25 }
  0xe6   :  { %v144_v32 = vpop.f32.mrb[6].mxu0 }
  0xe7   :  { %v145_v34 = vadd.f32 %v1162_v13, %v144_v32  ;;  %v967_v35 = vpop.f32.mrb[7].mxu0 }
  0xe8   :  { %v189_v27 = vld [vmem:[#allocation2 + $0x8] sm:$0xff] }
  0xe9   :  { %177 = vst.msk [vmem:[#allocation2 + $0x18] sm:$0xff] %vm173_vm5, %v145_v34 }
  0xea   :  { %v149_v41 = vpop.f32.mrb[8].mxu0 }
  0xeb   :  { %v150_v43 = vadd.f32 %v1162_v13, %v149_v41  ;;  %v970_v44 = vpop.f32.mrb[9].mxu0 }
  0xec   :  { %v269_v36 = vld [vmem:[#allocation2 + $0x10] sm:$0xff] }
  0xed   :  { %178 = vst.msk [vmem:[#allocation2 + $0x20] sm:$0xff] %vm173_vm5, %v150_v43 }
  0xee   :  { %v154_v50 = vpop.f32.mrb[10].mxu0 }
  0xef   :  { %v155_v52 = vadd.f32 %v1162_v13, %v154_v50  ;;  %v973_v53 = vpop.f32.mrb[11].mxu0 }
  0xf0   :  { %v345_v45 = vld [vmem:[#allocation2 + $0x18] sm:$0xff] }
  0xf1   :  { %179 = vst.msk [vmem:[#allocation2 + $0x28] sm:$0xff] %vm173_vm5, %v155_v52 }
  0xf2   :  { %v159_v59 = vpop.f32.mrb[12].mxu0 }
  0xf3   :  { %v160_v61 = vadd.f32 %v1162_v13, %v159_v59  ;;  %v976_v62 = vpop.f32.mrb[13].mxu0 }
  0xf4   :  { %v421_v54 = vld [vmem:[#allocation2 + $0x20] sm:$0xff] }
  0xf5   :  { %180 = vst.msk [vmem:[#allocation2 + $0x30] sm:$0xff] %vm173_vm5, %v160_v61 }
  0xf6   :  { %v164_v6 = vpop.f32.mrb[14].mxu0 }
  0xf7   :  { %v165_v8 = vadd.f32 %v1162_v13, %v164_v6  ;;  %v979_v11 = vpop.f32.mrb[15].mxu0 }
  0xf8   :  { %v497_v63 = vld [vmem:[#allocation2 + $0x28] sm:$0xff] }
  0xf9   :  { %181 = vst.msk [vmem:[#allocation2 + $0x38] sm:$0xff] %vm173_vm5, %v165_v8 }
  0xfa   :  { %v169_v18 = vpop.f32.mrb[16].mxu0 }
  0xfb   :  { %v170_v19 = vadd.f32 %v1162_v13, %v169_v18  ;;  %v982_v20 = vpop.f32.mrb[17].mxu0 }
  0xfc   :  { %v573_v12 = vld [vmem:[#allocation2 + $0x30] sm:$0xff] }
  0xfd   :  { %182 = vst.msk [vmem:[#allocation2 + $0x40] sm:$0xff] %vm173_vm5, %v170_v19 }
 0x100   :  { %v649_v21 = vld [vmem:[#allocation2 + $0x38] sm:$0xff] }
 0x104   :  { %v725_v26 = vld [vmem:[#allocation2 + $0x40] sm:$0xff] }
 0x1b3   :  { %v263_v28 = vpop.f32.mrb[0].mxu1 }
 0x1b4   :  { %v264_v29 = vadd.f32 %v263_v28, %v189_v27  ;;  %v989_v30 = vpop.f32.mrb[1].mxu1 }
 0x1b6   :  { %v267_v31 = vmax.f32 %v264_v29, 0.0 }
 0x1b8   :  { %995 = vmatmul.mubr.msk.f32.vlgmr.msra.gmra.mrb[2].mxu1 %vm173_vm5, %v267_v31 }
 0x1b9   :  { %1060 = vmatpush3.bf16.msk.msra.mxu1 %vm1145_vm4, %v1143_v9  ;;  %1001 = vmatprep.mubr.msk.f32.mxu1 %vm1090_vm0, %v1091_v3 }
 0x1ba   :  { %1061 = vmatprep.subr.bf16.mxu1 %v1089_v0 }
 0x28b   :  { %v339_v37 = vpop.f32.mrb[2].mxu1 }
 0x28c   :  { %v340_v38 = vadd.f32 %v339_v37, %v269_v36  ;;  %v996_v39 = vpop.f32.mrb[3].mxu1 }
 0x28e   :  { %v343_v40 = vmax.f32 %v340_v38, 0.0 }
 0x290   :  { %1002 = vmatmul.mubr.msk.f32.vlgmr.msra.gmra.mrb[4].mxu1 %vm173_vm5, %v343_v40 }
 0x291   :  { %1064 = vmatpush3.bf16.msk.msra.mxu1 %vm1145_vm4, %v1143_v9  ;;  %1008 = vmatprep.mubr.msk.f32.mxu1 %vm1090_vm0, %v1091_v3 }
 0x292   :  { %1065 = vmatprep.subr.bf16.mxu1 %v1089_v0 }
 0x363   :  { %v415_v46 = vpop.f32.mrb[4].mxu1 }
 0x364   :  { %v416_v47 = vadd.f32 %v415_v46, %v345_v45  ;;  %v1003_v48 = vpop.f32.mrb[5].mxu1 }
 0x366   :  { %v419_v49 = vmax.f32 %v416_v47, 0.0 }
 0x368   :  { %1009 = vmatmul.mubr.msk.f32.vlgmr.msra.gmra.mrb[6].mxu1 %vm173_vm5, %v419_v49 }
 0x369   :  { %1068 = vmatpush3.bf16.msk.msra.mxu1 %vm1145_vm4, %v1143_v9  ;;  %1015 = vmatprep.mubr.msk.f32.mxu1 %vm1090_vm0, %v1091_v3 }
 0x36a   :  { %1069 = vmatprep.subr.bf16.mxu1 %v1089_v0 }
 0x43b   :  { %v491_v55 = vpop.f32.mrb[6].mxu1 }
 0x43c   :  { %v492_v56 = vadd.f32 %v491_v55, %v421_v54  ;;  %v1010_v57 = vpop.f32.mrb[7].mxu1 }
 0x43e   :  { %v495_v58 = vmax.f32 %v492_v56, 0.0 }
 0x440   :  { %1016 = vmatmul.mubr.msk.f32.vlgmr.msra.gmra.mrb[8].mxu1 %vm173_vm5, %v495_v58 }
 0x441   :  { %1072 = vmatpush3.bf16.msk.msra.mxu1 %vm1145_vm4, %v1143_v9  ;;  %1022 = vmatprep.mubr.msk.f32.mxu1 %vm1090_vm0, %v1091_v3 }
 0x442   :  { %1073 = vmatprep.subr.bf16.mxu1 %v1089_v0 }
 0x513   :  { %v567_v1 = vpop.f32.mrb[8].mxu1 }
 0x514   :  { %v568_v2 = vadd.f32 %v567_v1, %v497_v63  ;;  %v1017_v4 = vpop.f32.mrb[9].mxu1 }
 0x516   :  { %v571_v5 = vmax.f32 %v568_v2, 0.0 }
 0x518   :  { %1023 = vmatmul.mubr.msk.f32.vlgmr.msra.gmra.mrb[10].mxu1 %vm173_vm5, %v571_v5 }
 0x519   :  { %1076 = vmatpush3.bf16.msk.msra.mxu1 %vm1145_vm4, %v1143_v9  ;;  %1029 = vmatprep.mubr.msk.f32.mxu1 %vm1090_vm0, %v1091_v3 }
 0x51a   :  { %1077 = vmatprep.subr.bf16.mxu1 %v1089_v0 }
 0x5eb   :  { %v643_v14 = vpop.f32.mrb[10].mxu1 }
 0x5ec   :  { %v644_v15 = vadd.f32 %v643_v14, %v573_v12  ;;  %v1024_v16 = vpop.f32.mrb[11].mxu1 }
 0x5ee   :  { %v647_v17 = vmax.f32 %v644_v15, 0.0 }
 0x5f0   :  { %1030 = vmatmul.mubr.msk.f32.vlgmr.msra.gmra.mrb[12].mxu1 %vm173_vm5, %v647_v17 }
 0x5f1   :  { %1080 = vmatpush3.bf16.msk.msra.mxu1 %vm1145_vm4, %v1143_v9  ;;  %1036 = vmatprep.mubr.msk.f32.mxu1 %vm1090_vm0, %v1091_v3  ;;  %v20_v9 = vld [vmem:[%s1284_s2 + $0x8] sm:$0xf] }
 0x5f2   :  { %1081 = vmatprep.subr.bf16.mxu1 %v1089_v0  ;;  %v19_v0 = vld [vmem:[%s1284_s2] sm:$0xff] }
 0x5f3   :  { %v1082_v13 = vpack.c.bf16 %v20_v9, %v19_v0 }
 0x6c3   :  { %v719_v22 = vpop.f32.mrb[12].mxu1 }
 0x6c4   :  { %v720_v23 = vadd.f32 %v719_v22, %v649_v21  ;;  %v1031_v24 = vpop.f32.mrb[13].mxu1 }
 0x6c6   :  { %v723_v25 = vmax.f32 %v720_v23, 0.0 }
 0x6c8   :  { %1037 = vmatmul.mubr.msk.f32.vlgmr.msra.gmra.mrb[14].mxu1 %vm173_vm5, %v723_v25 }
 0x6c9   :  { %1043 = vmatprep.mubr.msk.f32.mxu1 %vm1090_vm0, %v1091_v3  ;;  %1084 = vmatpush3.bf16.msk.msra.mxu1 %vm1145_vm4, %v1082_v13  ;;  %v911_v3 = vld [vmem:[%s1284_s2 + $0x10] ss:$0 sm:$0xff] }
 0x79b   :  { %v795_v27 = vpop.f32.mrb[14].mxu1 }
 0x79c   :  { %v796_v28 = vadd.f32 %v795_v27, %v725_v26  ;;  %v1038_v29 = vpop.f32.mrb[15].mxu1 }
 0x79e   :  { %v799_v30 = vmax.f32 %v796_v28, 0.0 }
 0x7a0   :  { %1044 = vmatmul.mubr.msk.f32.vlgmr.msra.gmra.mrb[16].mxu1 %vm173_vm5, %v799_v30 }
 0x873   :  { %v876_v31 = vpop.f32.mrb[16].mxu1 }
 0x874   :  { %v877_v32 = vadd.f32 %v911_v3, %v876_v31  ;;  %v1045_v33 = vpop.f32.mrb[17].mxu1 }
 0x876   :  { %880 = vst [vmem:[%s1285_s3] sm:$0xff] %v877_v32 }

</bundles_post_ra>
